<compile_context>
chip_gen: v5e
topology: v5e:2x2
jax: 0.10.0
libtpu: 0.0.40
codegen_flags: <defaults>
</compile_context>

<pallas_src>
import functools
import itertools

import numpy as np
import jax
import jax.numpy as jnp
from jax import lax
from jax.experimental import pallas as pl
from jax.experimental.pallas import tpu as pltpu


def _round_up(x, m):
    return ((x + m - 1) // m) * m


@functools.lru_cache(maxsize=None)
def _offset_tables(N, N_pad, n_offsets_padded):
    """Cached per-shape gather indices + validity mask (offset-major layout).

    Row s (offset d = s + 1), lane i holds the combination index of pair
    (i, i + d) when i < N - d, else 0 (masked out).
    """
    i = np.arange(N_pad, dtype=np.int64)
    pair_base = i * (2 * N - i - 1) // 2            # k of pair (i, i+1)
    idx = np.zeros((n_offsets_padded, N_pad), dtype=np.int32)
    msk = np.zeros((n_offsets_padded, N_pad), dtype=np.float32)
    for s in range(n_offsets_padded):
        d = s + 1
        valid = i < max(N - d, 0)
        idx[s] = np.where(valid, pair_base + (d - 1), 0).astype(np.int32)
        msk[s] = valid.astype(np.float32)
    return idx, msk


def _offset_major_logR(logRobs, N, N_pad, n_offsets_padded):
    """Reorder (6, K) combination-ordered logRobs into offset-major layout.

    Returns (n_offsets_padded * 8, N_pad) f32 where rows [s*8, s*8+6), lane i
    hold logRobs[:, pair(i, i+s+1)] for i < N - (s + 1), zero elsewhere.
    """
    idx, msk = _offset_tables(N, N_pad, n_offsets_padded)
    g = jnp.take(logRobs.astype(jnp.float32), jnp.asarray(idx), axis=1)  # (6,S,Np)
    g = g * jnp.asarray(msk)[None, :, :]
    g = jnp.transpose(g, (1, 0, 2))                                      # (S,6,Np)
    g = jnp.pad(g, ((0, 0), (0, 2), (0, 0)))                             # (S,8,Np)
    return g.reshape(n_offsets_padded * 8, N_pad)


def _make_kernel(N, N_pad, D, n_batches, K, reg_weight, cost):
    if cost not in ("l1", "l2"):
        raise ValueError("Cost " + cost + " not valid. Choose 'l1' or 'l2'.")
    inv_K = 1.0 / float(K)

    def kernel(p_ref, logr_ref, out_ref, acc_ref):
        j = pl.program_id(0)
        base = p_ref[...]                               # (8, N_pad) resident params

        @pl.when(j == 0)
        def _init():
            acc_ref[...] = jnp.zeros_like(acc_ref)

        # First offset of this batch; static when there is a single batch.
        if n_batches == 1:
            d0 = 1                                      # static -> static roll below
        else:
            d0 = j * D + 1                              # dynamic (d0 < N <= N_pad)

        # One roll to the batch's base offset; sub-offsets use static rolls.
        base_sh = pltpu.roll(base, N_pad - d0, axis=1)  # base_sh[:, i] = P[:, i+d0]

        # Hoisted lane iota (only the compare varies per sub-offset).
        if cost == "l1":
            lane = lax.broadcasted_iota(jnp.int32, (1, N_pad), 1)
            part = jnp.zeros((1, N_pad), jnp.float32)
        else:
            lane = lax.broadcasted_iota(jnp.int32, (8, N_pad), 1)
            part = jnp.zeros((8, N_pad), jnp.float32)

        for t in range(D):                              # static unroll, D <= 32
            d = d0 + t
            if t == 0:
                shifted = base_sh
            else:
                shifted = pltpu.roll(base_sh, (N_pad - t) % N_pad, axis=1)
            res = (shifted - base) - logr_ref[t * 8:(t + 1) * 8, :]
            if cost == "l1":
                ss = jnp.sum(res * res, axis=0, keepdims=True)   # (1, N_pad)
                ss = jnp.where(lane < (N - d), ss, 0.0)
                part = part + jnp.sqrt(ss)
            else:  # l2: defer both reductions; accumulate masked res^2
                res = jnp.where(lane < (N - d), res, 0.0)
                part = part + res * res

        acc_ref[...] += part                            # one vector acc update / step

        @pl.when(j == n_batches - 1)
        def _finalize():
            total = jnp.sum(jnp.sum(acc_ref[...], axis=1, keepdims=True),
                            axis=0, keepdims=True)      # (1, 1)
            reg = jnp.sum(jnp.sum(base * base, axis=1, keepdims=True),
                          axis=0, keepdims=True)
            val = total * inv_K + reg * reg_weight
            if cost == "l2":
                val = val + 6e-6                        # K pairs * 6 rows * 1e-6 / K
            out_ref[...] = jnp.broadcast_to(val, out_ref.shape)

    return kernel


def instance_rigid_loss(angle, translation, logRobs, reg_weight=0.001, cost="l1"):
    """Pallas forward pass of InstanceRigidModelLOG.

    angle, translation: (3, N); logRobs: (6, K) in itertools.combinations order.
    """
    N = angle.shape[1]
    if N < 2:
        raise ValueError("Need at least two timepoints.")
    K = N * (N - 1) // 2
    N_pad = max(128, _round_up(N, 128))

    # Offsets per grid step: big enough to amortize per-step overhead, capped at
    # 32 and at ~2 MiB per streamed logR tile (safe on v7x's 64 MiB VMEM too).
    bytes_per_offset = 8 * N_pad * 4
    D = int(max(1, min(N - 1, 32, (2 * 1024 * 1024) // bytes_per_offset)))
    n_batches = -(-(N - 1) // D)
    n_off_pad = n_batches * D

    P = jnp.zeros((8, N_pad), jnp.float32)
    P = P.at[0:3, 0:N].set(angle.astype(jnp.float32))
    P = P.at[3:6, 0:N].set(translation.astype(jnp.float32))
    logR2d = _offset_major_logR(logRobs, N, N_pad, n_off_pad)

    acc_shape = (1, N_pad) if cost == "l1" else (8, N_pad)
    kernel = _make_kernel(N, N_pad, D, n_batches, K, reg_weight, cost)

    out = pl.pallas_call(
        kernel,
        out_shape=jax.ShapeDtypeStruct((8, 128), jnp.float32),
        grid_spec=pltpu.PrefetchScalarGridSpec(
            num_scalar_prefetch=0,
            grid=(n_batches,),
            in_specs=[
                pl.BlockSpec((8, N_pad), lambda j: (0, 0)),        # P (resident)
                pl.BlockSpec((D * 8, N_pad), lambda j: (j, 0)),    # batched logR tile
            ],
            out_specs=pl.BlockSpec((8, 128), lambda j: (0, 0)),
            scratch_shapes=[pltpu.VMEM(acc_shape, jnp.float32)],   # vector accumulator
        ),
        compiler_params=pltpu.CompilerParams(
            dimension_semantics=("arbitrary",),
            vmem_limit_bytes=32 * 1024 * 1024,
        ),
    )(P, logR2d)
    return out[0, 0]


def _reference_loss(angle, translation, logRobs, reg_weight=0.001, cost="l1"):
    """Pure-JAX reference mirroring the torch forward()."""
    N = angle.shape[1]
    K = N * (N - 1) // 2
    P = jnp.concatenate([angle, translation], axis=0).astype(jnp.float32)
    cols = [P[:, t1] - P[:, t0] for t0, t1 in itertools.combinations(range(N), 2)]
    logTij = jnp.stack(cols, axis=1)
    if cost == "l1":
        loss = jnp.sum(jnp.sqrt(jnp.sum((logTij - logRobs) ** 2, axis=0))) / K
    else:
        loss = jnp.sum((logTij - logRobs) ** 2 + 1e-6) / K
    return loss + reg_weight * (jnp.sum(angle ** 2) + jnp.sum(translation ** 2))


if __name__ == "__main__":
    # Small shapes consistent with the module: N=8 timepoints -> K=28 pairs.
    N = 8
    K = N * (N - 1) // 2

    key = jax.random.PRNGKey(0)
    k1, k2, k3 = jax.random.split(key, 3)
    # Module __init__ uses zero parameters; small random values exercise the
    # full data path (roll / residual / norm / deferred reductions).
    angle = 0.1 * jax.random.normal(k1, (3, N), dtype=jnp.float32)
    translation = 0.1 * jax.random.normal(k2, (3, N), dtype=jnp.float32)
    logRobs = jax.random.normal(k3, (6, K), dtype=jnp.float32)

    loss_fn = jax.jit(instance_rigid_loss, static_argnames=("reg_weight", "cost"))

    ok = True
    for cost in ("l1", "l2"):
        loss = jax.block_until_ready(
            loss_fn(angle, translation, logRobs, reg_weight=0.001, cost=cost))
        ref = jax.block_until_ready(
            _reference_loss(angle, translation, logRobs, reg_weight=0.001, cost=cost))
        if not np.allclose(np.asarray(loss), np.asarray(ref), rtol=2e-5, atol=1e-6):
            ok = False
            print("MISMATCH", cost, float(loss), float(ref))
    if ok:
        print("KERNEL_OK")
</pallas_src>

<mosaic_0001>
module attributes {stable_mosaic.version = 11 : i64} {
  func.func @kernel(%arg0: i32, %arg1: memref<8x128xf32, #tpu.memory_space<vmem>>, %arg2: memref<56x128xf32, #tpu.memory_space<vmem>>, %arg3: memref<8x128xf32, #tpu.memory_space<vmem>>, %arg4: memref<1x128xf32, #tpu.memory_space<vmem>>) attributes {dimension_semantics = [#tpu.dimension_semantics<arbitrary>], iteration_bounds = array<i64: 1>, scalar_prefetch = 0 : i64, scratch_operands = 1 : i64, tpu.core_type = #tpu.core_type<tc>, window_params = [{pipeline_mode = #tpu.pipeline_mode<synchronous>, transform_indices = @transform_0, window_bounds = array<i64: 8, 128>}, {transform_indices = @transform_1, window_bounds = array<i64: 56, 128>}, {pipeline_mode = #tpu.pipeline_mode<synchronous>, transform_indices = @transform_2, window_bounds = array<i64: 8, 128>}]} {
    %c0 = arith.constant 0 : index
    %c0_0 = arith.constant 0 : index
    %0 = vector.load %arg1[%c0, %c0_0] : memref<8x128xf32, #tpu.memory_space<vmem>>, vector<8x128xf32>
    %c0_i32 = arith.constant 0 : i32
    %1 = arith.cmpi eq, %arg0, %c0_i32 : i32
    %2 = arith.extui %1 : i1 to i32
    %c0_i32_1 = arith.constant 0 : i32
    %3 = arith.cmpi ne, %2, %c0_i32_1 : i32
    scf.if %3 {
      %cst_31 = arith.constant 0.000000e+00 : f32
      %103 = vector.broadcast %cst_31 : f32 to vector<1x128xf32>
      %c0_32 = arith.constant 0 : index
      %c0_33 = arith.constant 0 : index
      %104 = vector.load %arg4[%c0_32, %c0_33] : memref<1x128xf32, #tpu.memory_space<vmem>>, vector<1x128xf32>
      tpu.vector_store %arg4[%c0_32, %c0_33], %103 {strides = array<i32>} : memref<1x128xf32, #tpu.memory_space<vmem>>, vector<1x128xf32>,
    } else {
    }
    %c127_i32 = arith.constant 127 : i32
    %4 = tpu.dynamic_rotate %0 by %c127_i32 dim 1 : vector<8x128xf32>, i32 -> vector<8x128xf32>
    %5 = tpu.iota {dimensions = array<i32: 1>} : vector<1x128xi32>
    %cst = arith.constant 0.000000e+00 : f32
    %6 = vector.broadcast %cst : f32 to vector<1x128xf32>
    %7 = arith.subf %4, %0 : vector<8x128xf32>
    %c0_2 = arith.constant 0 : index
    %c0_3 = arith.constant 0 : index
    %8 = vector.load %arg2[%c0_2, %c0_3] : memref<56x128xf32, #tpu.memory_space<vmem>>, vector<8x128xf32>
    %9 = arith.subf %7, %8 : vector<8x128xf32>
    %10 = arith.mulf %9, %9 : vector<8x128xf32>
    %cst_4 = arith.constant dense<0.000000e+00> : vector<128xf32>
    %11 = vector.multi_reduction <add>, %10, %cst_4 [0] : vector<8x128xf32> to vector<128xf32>
    %12 = vector.shape_cast %11 : vector<128xf32> to vector<1x128xf32>
    %c7_i32 = arith.constant 7 : i32
    %13 = vector.broadcast %c7_i32 : i32 to vector<1x128xi32>
    %14 = arith.cmpi slt, %5, %13 : vector<1x128xi32>
    %cst_5 = arith.constant 0.000000e+00 : f32
    %15 = vector.broadcast %cst_5 : f32 to vector<1x128xf32>
    %16 = arith.select %14, %12, %15 : vector<1x128xi1>, vector<1x128xf32>
    %17 = math.sqrt %16 : vector<1x128xf32>
    %18 = arith.addf %6, %17 : vector<1x128xf32>
    %c127_i32_6 = arith.constant 127 : i32
    %19 = tpu.dynamic_rotate %4 by %c127_i32_6 dim 1 : vector<8x128xf32>, i32 -> vector<8x128xf32>
    %20 = arith.subf %19, %0 : vector<8x128xf32>
    %c8 = arith.constant 8 : index
    %c0_7 = arith.constant 0 : index
    %21 = vector.load %arg2[%c8, %c0_7] : memref<56x128xf32, #tpu.memory_space<vmem>>, vector<8x128xf32>
    %22 = arith.subf %20, %21 : vector<8x128xf32>
    %23 = arith.mulf %22, %22 : vector<8x128xf32>
    %cst_8 = arith.constant dense<0.000000e+00> : vector<128xf32>
    %24 = vector.multi_reduction <add>, %23, %cst_8 [0] : vector<8x128xf32> to vector<128xf32>
    %25 = vector.shape_cast %24 : vector<128xf32> to vector<1x128xf32>
    %c6_i32 = arith.constant 6 : i32
    %26 = vector.broadcast %c6_i32 : i32 to vector<1x128xi32>
    %27 = arith.cmpi slt, %5, %26 : vector<1x128xi32>
    %cst_9 = arith.constant 0.000000e+00 : f32
    %28 = vector.broadcast %cst_9 : f32 to vector<1x128xf32>
    %29 = arith.select %27, %25, %28 : vector<1x128xi1>, vector<1x128xf32>
    %30 = math.sqrt %29 : vector<1x128xf32>
    %31 = arith.addf %18, %30 : vector<1x128xf32>
    %c126_i32 = arith.constant 126 : i32
    %32 = tpu.dynamic_rotate %4 by %c126_i32 dim 1 : vector<8x128xf32>, i32 -> vector<8x128xf32>
    %33 = arith.subf %32, %0 : vector<8x128xf32>
    %c16 = arith.constant 16 : index
    %c0_10 = arith.constant 0 : index
    %34 = vector.load %arg2[%c16, %c0_10] : memref<56x128xf32, #tpu.memory_space<vmem>>, vector<8x128xf32>
    %35 = arith.subf %33, %34 : vector<8x128xf32>
    %36 = arith.mulf %35, %35 : vector<8x128xf32>
    %cst_11 = arith.constant dense<0.000000e+00> : vector<128xf32>
    %37 = vector.multi_reduction <add>, %36, %cst_11 [0] : vector<8x128xf32> to vector<128xf32>
    %38 = vector.shape_cast %37 : vector<128xf32> to vector<1x128xf32>
    %c5_i32 = arith.constant 5 : i32
    %39 = vector.broadcast %c5_i32 : i32 to vector<1x128xi32>
    %40 = arith.cmpi slt, %5, %39 : vector<1x128xi32>
    %cst_12 = arith.constant 0.000000e+00 : f32
    %41 = vector.broadcast %cst_12 : f32 to vector<1x128xf32>
    %42 = arith.select %40, %38, %41 : vector<1x128xi1>, vector<1x128xf32>
    %43 = math.sqrt %42 : vector<1x128xf32>
    %44 = arith.addf %31, %43 : vector<1x128xf32>
    %c125_i32 = arith.constant 125 : i32
    %45 = tpu.dynamic_rotate %4 by %c125_i32 dim 1 : vector<8x128xf32>, i32 -> vector<8x128xf32>
    %46 = arith.subf %45, %0 : vector<8x128xf32>
    %c24 = arith.constant 24 : index
    %c0_13 = arith.constant 0 : index
    %47 = vector.load %arg2[%c24, %c0_13] : memref<56x128xf32, #tpu.memory_space<vmem>>, vector<8x128xf32>
    %48 = arith.subf %46, %47 : vector<8x128xf32>
    %49 = arith.mulf %48, %48 : vector<8x128xf32>
    %cst_14 = arith.constant dense<0.000000e+00> : vector<128xf32>
    %50 = vector.multi_reduction <add>, %49, %cst_14 [0] : vector<8x128xf32> to vector<128xf32>
    %51 = vector.shape_cast %50 : vector<128xf32> to vector<1x128xf32>
    %c4_i32 = arith.constant 4 : i32
    %52 = vector.broadcast %c4_i32 : i32 to vector<1x128xi32>
    %53 = arith.cmpi slt, %5, %52 : vector<1x128xi32>
    %cst_15 = arith.constant 0.000000e+00 : f32
    %54 = vector.broadcast %cst_15 : f32 to vector<1x128xf32>
    %55 = arith.select %53, %51, %54 : vector<1x128xi1>, vector<1x128xf32>
    %56 = math.sqrt %55 : vector<1x128xf32>
    %57 = arith.addf %44, %56 : vector<1x128xf32>
    %c124_i32 = arith.constant 124 : i32
    %58 = tpu.dynamic_rotate %4 by %c124_i32 dim 1 : vector<8x128xf32>, i32 -> vector<8x128xf32>
    %59 = arith.subf %58, %0 : vector<8x128xf32>
    %c32 = arith.constant 32 : index
    %c0_16 = arith.constant 0 : index
    %60 = vector.load %arg2[%c32, %c0_16] : memref<56x128xf32, #tpu.memory_space<vmem>>, vector<8x128xf32>
    %61 = arith.subf %59, %60 : vector<8x128xf32>
    %62 = arith.mulf %61, %61 : vector<8x128xf32>
    %cst_17 = arith.constant dense<0.000000e+00> : vector<128xf32>
    %63 = vector.multi_reduction <add>, %62, %cst_17 [0] : vector<8x128xf32> to vector<128xf32>
    %64 = vector.shape_cast %63 : vector<128xf32> to vector<1x128xf32>
    %c3_i32 = arith.constant 3 : i32
    %65 = vector.broadcast %c3_i32 : i32 to vector<1x128xi32>
    %66 = arith.cmpi slt, %5, %65 : vector<1x128xi32>
    %cst_18 = arith.constant 0.000000e+00 : f32
    %67 = vector.broadcast %cst_18 : f32 to vector<1x128xf32>
    %68 = arith.select %66, %64, %67 : vector<1x128xi1>, vector<1x128xf32>
    %69 = math.sqrt %68 : vector<1x128xf32>
    %70 = arith.addf %57, %69 : vector<1x128xf32>
    %c123_i32 = arith.constant 123 : i32
    %71 = tpu.dynamic_rotate %4 by %c123_i32 dim 1 : vector<8x128xf32>, i32 -> vector<8x128xf32>
    %72 = arith.subf %71, %0 : vector<8x128xf32>
    %c40 = arith.constant 40 : index
    %c0_19 = arith.constant 0 : index
    %73 = vector.load %arg2[%c40, %c0_19] : memref<56x128xf32, #tpu.memory_space<vmem>>, vector<8x128xf32>
    %74 = arith.subf %72, %73 : vector<8x128xf32>
    %75 = arith.mulf %74, %74 : vector<8x128xf32>
    %cst_20 = arith.constant dense<0.000000e+00> : vector<128xf32>
    %76 = vector.multi_reduction <add>, %75, %cst_20 [0] : vector<8x128xf32> to vector<128xf32>
    %77 = vector.shape_cast %76 : vector<128xf32> to vector<1x128xf32>
    %c2_i32 = arith.constant 2 : i32
    %78 = vector.broadcast %c2_i32 : i32 to vector<1x128xi32>
    %79 = arith.cmpi slt, %5, %78 : vector<1x128xi32>
    %cst_21 = arith.constant 0.000000e+00 : f32
    %80 = vector.broadcast %cst_21 : f32 to vector<1x128xf32>
    %81 = arith.select %79, %77, %80 : vector<1x128xi1>, vector<1x128xf32>
    %82 = math.sqrt %81 : vector<1x128xf32>
    %83 = arith.addf %70, %82 : vector<1x128xf32>
    %c122_i32 = arith.constant 122 : i32
    %84 = tpu.dynamic_rotate %4 by %c122_i32 dim 1 : vector<8x128xf32>, i32 -> vector<8x128xf32>
    %85 = arith.subf %84, %0 : vector<8x128xf32>
    %c48 = arith.constant 48 : index
    %c0_22 = arith.constant 0 : index
    %86 = vector.load %arg2[%c48, %c0_22] : memref<56x128xf32, #tpu.memory_space<vmem>>, vector<8x128xf32>
    %87 = arith.subf %85, %86 : vector<8x128xf32>
    %88 = arith.mulf %87, %87 : vector<8x128xf32>
    %cst_23 = arith.constant dense<0.000000e+00> : vector<128xf32>
    %89 = vector.multi_reduction <add>, %88, %cst_23 [0] : vector<8x128xf32> to vector<128xf32>
    %90 = vector.shape_cast %89 : vector<128xf32> to vector<1x128xf32>
    %c1_i32 = arith.constant 1 : i32
    %91 = vector.broadcast %c1_i32 : i32 to vector<1x128xi32>
    %92 = arith.cmpi slt, %5, %91 : vector<1x128xi32>
    %cst_24 = arith.constant 0.000000e+00 : f32
    %93 = vector.broadcast %cst_24 : f32 to vector<1x128xf32>
    %94 = arith.select %92, %90, %93 : vector<1x128xi1>, vector<1x128xf32>
    %95 = math.sqrt %94 : vector<1x128xf32>
    %96 = arith.addf %83, %95 : vector<1x128xf32>
    %c0_25 = arith.constant 0 : index
    %c0_26 = arith.constant 0 : index
    %97 = vector.load %arg4[%c0_25, %c0_26] : memref<1x128xf32, #tpu.memory_space<vmem>>, vector<1x128xf32>
    %98 = arith.addf %97, %96 : vector<1x128xf32>
    %c0_27 = arith.constant 0 : index
    %c0_28 = arith.constant 0 : index
    %99 = vector.load %arg4[%c0_27, %c0_28] : memref<1x128xf32, #tpu.memory_space<vmem>>, vector<1x128xf32>
    tpu.vector_store %arg4[%c0_27, %c0_28], %98 {strides = array<i32>} : memref<1x128xf32, #tpu.memory_space<vmem>>, vector<1x128xf32>,
    %c0_i32_29 = arith.constant 0 : i32
    %100 = arith.cmpi eq, %arg0, %c0_i32_29 : i32
    %101 = arith.extui %100 : i1 to i32
    %c0_i32_30 = arith.constant 0 : i32
    %102 = arith.cmpi ne, %101, %c0_i32_30 : i32
    scf.if %102 {
      %c0_31 = arith.constant 0 : index
      %c0_32 = arith.constant 0 : index
      %103 = vector.load %arg4[%c0_31, %c0_32] : memref<1x128xf32, #tpu.memory_space<vmem>>, vector<1x128xf32>
      %cst_33 = arith.constant dense<0.000000e+00> : vector<1xf32>
      %104 = vector.multi_reduction <add>, %103, %cst_33 [1] : vector<1x128xf32> to vector<1xf32>
      %105 = vector.shape_cast %104 : vector<1xf32> to vector<1x1xf32>
      %cst_34 = arith.constant dense<0.000000e+00> : vector<1xf32>
      %106 = vector.multi_reduction <add>, %105, %cst_34 [0] : vector<1x1xf32> to vector<1xf32>
      %107 = vector.shape_cast %106 : vector<1xf32> to vector<1x1xf32>
      %108 = arith.mulf %0, %0 : vector<8x128xf32>
      %cst_35 = arith.constant dense<0.000000e+00> : vector<8xf32>
      %109 = vector.multi_reduction <add>, %108, %cst_35 [1] : vector<8x128xf32> to vector<8xf32>
      %110 = vector.shape_cast %109 : vector<8xf32> to vector<8x1xf32>
      %cst_36 = arith.constant dense<0.000000e+00> : vector<1xf32>
      %111 = vector.multi_reduction <add>, %110, %cst_36 [0] : vector<8x1xf32> to vector<1xf32>
      %112 = vector.shape_cast %111 : vector<1xf32> to vector<1x1xf32>
      %cst_37 = arith.constant 0.0357142873 : f32
      %113 = vector.broadcast %cst_37 : f32 to vector<1x1xf32>
      %114 = arith.mulf %107, %113 : vector<1x1xf32>
      %cst_38 = arith.constant 1.000000e-03 : f32
      %115 = vector.broadcast %cst_38 : f32 to vector<1x1xf32>
      %116 = arith.mulf %112, %115 : vector<1x1xf32>
      %117 = arith.addf %114, %116 : vector<1x1xf32>
      %118 = vector.shape_cast %117 : vector<1x1xf32> to vector<1x1xf32>
      %119 = vector.broadcast %118 : vector<1x1xf32> to vector<8x128xf32>
      %c0_39 = arith.constant 0 : index
      %c0_40 = arith.constant 0 : index
      %120 = vector.load %arg3[%c0_39, %c0_40] : memref<8x128xf32, #tpu.memory_space<vmem>>, vector<8x128xf32>
      tpu.vector_store %arg3[%c0_39, %c0_40], %119 {strides = array<i32>} : memref<8x128xf32, #tpu.memory_space<vmem>>, vector<8x128xf32>,
    } else {
    }
    return
  }
  func.func @transform_0(%arg0: i32) -> (i32, i32) {
    %c0_i32 = arith.constant 0 : i32
    %c0_i32_0 = arith.constant 0 : i32
    %c0_i32_1 = arith.constant 0 : i32
    return %c0_i32, %c0_i32_0 : i32, i32
  }
  func.func @transform_1(%arg0: i32) -> (i32, i32) {
    %c0_i32 = arith.constant 0 : i32
    %c0_i32_0 = arith.constant 0 : i32
    return %arg0, %c0_i32 : i32, i32
  }
  func.func @transform_2(%arg0: i32) -> (i32, i32) {
    %c0_i32 = arith.constant 0 : i32
    %c0_i32_0 = arith.constant 0 : i32
    %c0_i32_1 = arith.constant 0 : i32
    return %c0_i32, %c0_i32_0 : i32, i32
  }
}

</mosaic_0001>

<bundles_post_ra>
// kernel: instance_rigid_loss.1
= control target key start
LH: loop header
LB: loop body
LE: loop exit
PB: predicated region body
PF: predicated region fallthrough
CT: control target
= control target key end

     0   :  { %s259_s11 = smov 127   ;;  %s260_s12 = smov 124   ;;  %v19_v21 = vlaneseq  ;;  %s383_s0 = inlined_call_operand.vmem [shape: f32[8,128], index: 0, kind: input, shape index: {}]   ;;  %s384_s1 = inlined_call_operand.vmem [shape: f32[56,128], index: 1, kind: input, shape index: {}]   ;;  %s385_s2 = inlined_call_operand.vmem [shape: f32[8,128], index: 2, kind: output, shape index: {}]  }
   0x1   :  { %v284_v0 = vld [vmem:[%s383_s0] sm:$0xff]  ;;  %s261_s13 = smov 126   ;;  %s262_s14 = smov 123   ;;  %v157_v13 = vld [vmem:[%s384_s1 + $0x28] sm:$0xff]  ;;  %v76_v31 = vld [vmem:[%s384_s1 + $0x10] sm:$0xff] }
   0x2   :  { %17 = vrot.lane.b32.xlu0 %v284_v0, %s259_s11  ;;  %s263_s15 = smov 125   ;;  %s264_s16 = smov 122   ;;  %v22_v3 = vld [vmem:[%s384_s1] sm:$0xff]  ;;  %v299_v25 = vand.u32 127, %v19_v21  ;;  %v49_v36 = vld [vmem:[%s384_s1 + $0x8] sm:$0xff]  ;;  %v103_v50 = vld [vmem:[%s384_s1 + $0x18] sm:$0xff] }
   0x3   :  { %v130_v8 = vld [vmem:[%s384_s1 + $0x20] sm:$0xff]  ;;  %v184_v52 = vld [vmem:[%s384_s1 + $0x30] sm:$0xff] }
   0x4   :  { %vm31_vm0 = vcmp.lt.s32.totalorder %v299_v25, 7  ;;  %vm139_vm1 = vcmp.lt.s32.totalorder %v299_v25, 3  ;;  %vm166_vm2 = vcmp.lt.s32.totalorder %v299_v25, 2  ;;  %vm85_vm3 = vcmp.lt.s32.totalorder %v299_v25, 5 }
   0x5   :  { %vm58_vm4 = vcmp.lt.s32.totalorder %v299_v25, 6  ;;  %vm112_vm5 = vcmp.lt.s32.totalorder %v299_v25, 4  ;;  %vm193_vm6 = vcmp.lt.s32.totalorder %v299_v25, 1 }
  0x74   :  { %v18_v1 = vpop.permute.xlu0 %17 }
  0x75   :  { %127 = vrot.lane.b32.xlu2 %v18_v1, %s260_s12  ;;  %73 = vrot.lane.b32.xlu1 %v18_v1, %s261_s13  ;;  %v21_v2 = vsub.f32 %v18_v1, %v284_v0 }
  0x76   :  { %46 = vrot.lane.b32.xlu0 %v18_v1, %s259_s11 }
  0x77   :  { %v23_v4 = vsub.f32 %v21_v2, %v22_v3 }
  0x79   :  { %v24_v5 = vmul.f32 %v23_v4, %v23_v4 }
  0x7b   :  { %v25_v7 = vrot.slane %v24_v5, 4 }
  0x7d   :  { %154 = vrot.lane.b32.xlu2 %v18_v1, %s262_s14  ;;  %100 = vrot.lane.b32.xlu1 %v18_v1, %s263_s15  ;;  %v26_v11 = vadd.f32 %v25_v7, %v24_v5 }
  0x7e   :  { %181 = vrot.lane.b32.xlu0 %v18_v1, %s264_s16 }
  0x7f   :  { %v27_v15 = vrot.slane %v26_v11, 2 }
  0x81   :  { %v28_v19 = vadd.f32 %v27_v15, %v26_v11 }
  0x83   :  { %v29_v24 = vrot.slane %v28_v19, 1 }
  0x85   :  { %v30_v28 = vadd.f32 %v29_v24, %v28_v19  ;;  %v220_v24 = vmul.f32 %v284_v0, %v284_v0 }
  0x87   :  { %v305_v33 = vsel %vm31_vm0, %v30_v28, 0.0 }
  0x88   :  { %245 = vrsqrt.f32 %v305_v33  ;;  %vm40_vm7 = vcmp.eq.f32.partialorder %v305_v33, inf  ;;  %vm42_vm10 = vcmp.eq.f32.partialorder %v305_v33, 0.0 }
  0x8e   :  { %v246_v54 = vpop.eup %245 }
  0x8f   :  { %v34_v63 = vmul.f32 %v246_v54, %v305_v33 }
  0xa7   :  { %221 = vadd.xlane.f32.xlu1 %v220_v24 }
  0xcf   :  { %v128_v6 = vpop.permute.xlu2 %127 }
  0xd0   :  { %v129_v9 = vsub.f32 %v128_v6, %v284_v0 }
  0xd2   :  { %v131_v10 = vsub.f32 %v129_v9, %v130_v8 }
  0xd4   :  { %v132_v12 = vmul.f32 %v131_v10, %v131_v10  ;;  %v35_v10 = vmul.f32 %v246_v54, %v34_v63 }
  0xd6   :  { %v133_v18 = vrot.slane %v132_v12, 4  ;;  %v36_v21 = vmul.f32 0.5, %v35_v10 }
  0xd7   :  { %v155_v14 = vpop.permute.xlu2 %154 }
  0xd8   :  { %v156_v16 = vsub.f32 %v155_v14, %v284_v0  ;;  %v134_v23 = vadd.f32 %v133_v18, %v132_v12 }
  0xda   :  { %v158_v17 = vsub.f32 %v156_v16, %v157_v13  ;;  %v135_v27 = vrot.slane %v134_v23, 2  ;;  %v265_v16 = vmov 0.0  }
  0xdb   :  { %16 = vst [vmem:[#allocation2] sm:$0x1] %v265_v16 }
  0xdc   :  { %v159_v20 = vmul.f32 %v158_v17, %v158_v17  ;;  %v136_v30 = vadd.f32 %v135_v27, %v134_v23 }
  0xde   :  { %v160_v22 = vrot.slane %v159_v20, 4  ;;  %v137_v40 = vrot.slane %v136_v30, 1 }
  0xe0   :  { %v161_v26 = vadd.f32 %v160_v22, %v159_v20  ;;  %v138_v46 = vadd.f32 %v137_v40, %v136_v30 }
  0xe2   :  { %v162_v29 = vrot.slane %v161_v26, 2  ;;  %v322_v59 = vsel %vm139_vm1, %v138_v46, 0.0 }
  0xe3   :  { %247 = vrsqrt.f32 %v322_v59  ;;  %vm148_vm12 = vcmp.eq.f32.partialorder %v322_v59, inf  ;;  %vm150_vm1 = vcmp.eq.f32.partialorder %v322_v59, 0.0 }
  0xe4   :  { %v163_v38 = vadd.f32 %v162_v29, %v161_v26 }
  0xe6   :  { %v164_v43 = vrot.slane %v163_v38, 1 }
  0xe7   :  { %v74_v32 = vpop.permute.xlu1 %73 }
  0xe8   :  { %v75_v34 = vsub.f32 %v74_v32, %v284_v0  ;;  %v47_v35 = vpop.permute.xlu0 %46  ;;  %v165_v56 = vadd.f32 %v164_v43, %v163_v38 }
  0xe9   :  { %v48_v37 = vsub.f32 %v47_v35, %v284_v0  ;;  %v248_v17 = vpop.eup %247 }
  0xea   :  { %v77_v39 = vsub.f32 %v75_v34, %v76_v31  ;;  %v327_v4 = vsel %vm166_vm2, %v165_v56, 0.0  ;;  %v142_v27 = vmul.f32 %v248_v17, %v322_v59  ;;  %v37_v31 = vsub.f32 1.5, %v36_v21 }
  0xeb   :  { %v50_v42 = vsub.f32 %v48_v37, %v49_v36  ;;  %249 = vrsqrt.f32 %v327_v4  ;;  %vm175_vm0 = vcmp.eq.f32.partialorder %v327_v4, inf }
  0xec   :  { %v78_v41 = vmul.f32 %v77_v39, %v77_v39 }
  0xed   :  { %v51_v45 = vmul.f32 %v50_v42, %v50_v42  ;;  %v38_v42 = vmul.f32 %v246_v54, %v37_v31 }
  0xee   :  { %v79_v44 = vrot.slane %v78_v41, 4 }
  0xef   :  { %v101_v47 = vpop.permute.xlu1 %100  ;;  %v52_v49 = vrot.slane %v51_v45, 4 }
  0xf0   :  { %v80_v48 = vadd.f32 %v79_v44, %v78_v41  ;;  %v102_v51 = vsub.f32 %v101_v47, %v284_v0  ;;  %v182_v53 = vpop.permute.xlu0 %181 }
  0xf1   :  { %v183_v55 = vsub.f32 %v182_v53, %v284_v0  ;;  %v53_v58 = vadd.f32 %v52_v49, %v51_v45  ;;  %v250_v26 = vpop.eup %249  ;;  %v143_v0 = vmul.f32 %v248_v17, %v142_v27  ;;  %v39_v49 = vmul.f32 %v38_v42, %v305_v33 }
  0xf2   :  { %v81_v57 = vrot.slane %v80_v48, 2  ;;  %v104_v60 = vsub.f32 %v102_v51, %v103_v50  ;;  %v169_v32 = vmul.f32 %v250_v26, %v327_v4 }
  0xf3   :  { %v185_v61 = vsub.f32 %v183_v55, %v184_v52  ;;  %v54_v1 = vrot.slane %v53_v58, 2  ;;  %v144_v45 = vmul.f32 0.5, %v143_v0 }
  0xf4   :  { %v82_v62 = vadd.f32 %v81_v57, %v80_v48  ;;  %v105_v2 = vmul.f32 %v104_v60, %v104_v60  ;;  %v170_v43 = vmul.f32 %v250_v26, %v169_v32  ;;  %v41_v60 = vsel %vm40_vm7, %v305_v33, %v39_v49 }
  0xf5   :  { %v186_v3 = vmul.f32 %v185_v61, %v185_v61  ;;  %v55_v6 = vadd.f32 %v54_v1, %v53_v58  ;;  %v145_v52 = vsub.f32 1.5, %v144_v45 }
  0xf6   :  { %v83_v5 = vrot.slane %v82_v62, 1  ;;  %v106_v7 = vrot.slane %v105_v2, 4  ;;  %v171_v48 = vmul.f32 0.5, %v170_v43 }
  0xf7   :  { %v187_v8 = vrot.slane %v186_v3, 4  ;;  %v56_v11 = vrot.slane %v55_v6, 1  ;;  %v146_v63 = vmul.f32 %v248_v17, %v145_v52 }
  0xf8   :  { %v84_v9 = vadd.f32 %v83_v5, %v82_v62  ;;  %v107_v12 = vadd.f32 %v106_v7, %v105_v2  ;;  %v172_v58 = vsub.f32 1.5, %v171_v48  ;;  %v43_v7 = vand.u32 2147483648, %v305_v33 }
  0xf9   :  { %v188_v13 = vadd.f32 %v187_v8, %v186_v3  ;;  %v57_v15 = vadd.f32 %v56_v11, %v55_v6 }
  0xfa   :  { %v332_v14 = vsel %vm85_vm3, %v84_v9, 0.0  ;;  %v108_v19 = vrot.slane %v107_v12, 2  ;;  %v173_v10 = vmul.f32 %v250_v26, %v172_v58  ;;  %vm177_vm3 = vcmp.eq.f32.partialorder %v327_v4, 0.0 }
  0xfb   :  { %251 = vrsqrt.f32 %v332_v14  ;;  %v59_v18 = vsel %vm58_vm4, %v57_v15, 0.0  ;;  %v189_v20 = vrot.slane %v188_v13, 2  ;;  %vm94_vm11 = vcmp.eq.f32.partialorder %v332_v14, inf }
  0xfc   :  { %253 = vrsqrt.f32 %v59_v18  ;;  %v109_v22 = vadd.f32 %v108_v19, %v107_v12  ;;  %vm67_vm8 = vcmp.eq.f32.partialorder %v59_v18, inf  ;;  %v70_v1 = vand.u32 2147483648, %v59_v18 }
  0xfd   :  { %v190_v23 = vadd.f32 %v189_v20, %v188_v13  ;;  %vm69_vm9 = vcmp.eq.f32.partialorder %v59_v18, 0.0  ;;  %v147_v12 = vmul.f32 %v146_v63, %v322_v59  ;;  %v44_v13 = vsel %vm42_vm10, %v43_v7, %v41_v60 }
  0xfe   :  { %v110_v28 = vrot.slane %v109_v22, 1  ;;  %v174_v21 = vmul.f32 %v173_v10, %v327_v4  ;;  %vm96_vm13 = vcmp.eq.f32.partialorder %v332_v14, 0.0 }
  0xff   :  { %v191_v29 = vrot.slane %v190_v23, 1 }
 0x100   :  { %v111_v35 = vadd.f32 %v110_v28, %v109_v22  ;;  %v149_v22 = vsel %vm148_vm12, %v322_v59, %v147_v12 }
 0x101   :  { %v252_v30 = vpop.eup %251  ;;  %v192_v36 = vadd.f32 %v191_v29, %v190_v23  ;;  %v151_v29 = vand.u32 2147483648, %v322_v59  ;;  %v208_v59 = vld [vmem:[#allocation2] sm:$0x1] }
 0x102   :  { %v88_v34 = vmul.f32 %v252_v30, %v332_v14  ;;  %v254_v37 = vpop.eup %253  ;;  %v342_v40 = vsel %vm112_vm5, %v111_v35, 0.0  ;;  %vm215_vm5 = vcmask 1040384  }
 0x103   :  { %v61_v39 = vmul.f32 %v254_v37, %v59_v18  ;;  %v344_v41 = vsel %vm193_vm6, %v192_v36, 0.0  ;;  %255 = vrsqrt.f32 %v342_v40  ;;  %vm121_vm14 = vcmp.eq.f32.partialorder %v342_v40, inf }
 0x104   :  { %v89_v38 = vmul.f32 %v252_v30, %v88_v34  ;;  %257 = vrsqrt.f32 %v344_v41  ;;  %v124_v24 = vand.u32 2147483648, %v342_v40  ;;  %vm123_vm15 = vcmp.eq.f32.partialorder %v342_v40, 0.0 }
 0x105   :  { %v62_v25 = vmul.f32 %v254_v37, %v61_v39  ;;  %v152_v32 = vsel %vm150_vm1, %v151_v29, %v149_v22  ;;  %v178_v34 = vand.u32 2147483648, %v327_v4  ;;  %vm202_vm2 = vcmp.eq.f32.partialorder %v344_v41, inf }
 0x106   :  { %v90_v44 = vmul.f32 0.5, %v89_v38  ;;  %v205_v0 = vand.u32 2147483648, %v344_v41  ;;  %vm204_vm4 = vcmp.eq.f32.partialorder %v344_v41, 0.0 }
 0x107   :  { %v63_v47 = vmul.f32 0.5, %v62_v25 }
 0x108   :  { %v91_v46 = vsub.f32 1.5, %v90_v44 }
 0x109   :  { %v64_v50 = vsub.f32 1.5, %v63_v47  ;;  %v256_v51 = vpop.eup %255 }
 0x10a   :  { %v258_v53 = vpop.eup %257  ;;  %v92_v55 = vmul.f32 %v252_v30, %v91_v46  ;;  %v115_v54 = vmul.f32 %v256_v51, %v342_v40  ;;  %v176_v30 = vsel %vm175_vm0, %v327_v4, %v174_v21 }
 0x10b   :  { %v65_v56 = vmul.f32 %v254_v37, %v64_v50  ;;  %v196_v57 = vmul.f32 %v258_v53, %v344_v41  ;;  %v179_v37 = vsel %vm177_vm3, %v178_v34, %v176_v30 }
 0x10c   :  { %v116_v62 = vmul.f32 %v256_v51, %v115_v54  ;;  %v93_v3 = vmul.f32 %v92_v55, %v332_v14 }
 0x10d   :  { %v66_v61 = vmul.f32 %v65_v56, %v59_v18  ;;  %v197_v2 = vmul.f32 %v258_v53, %v196_v57 }
 0x10e   :  { %v117_v6 = vmul.f32 0.5, %v116_v62  ;;  %v95_v16 = vsel %vm94_vm11, %v332_v14, %v93_v3 }
 0x10f   :  { %v68_v5 = vsel %vm67_vm8, %v59_v18, %v66_v61  ;;  %v198_v9 = vmul.f32 0.5, %v197_v2  ;;  %v97_v18 = vand.u32 2147483648, %v332_v14 }
 0x110   :  { %v71_v8 = vsel %vm69_vm9, %v70_v1, %v68_v5  ;;  %v118_v11 = vsub.f32 1.5, %v117_v6 }
 0x111   :  { %v199_v15 = vsub.f32 1.5, %v198_v9  ;;  %v72_v17 = vadd.f32 %v71_v8, %v44_v13  ;;  %v98_v23 = vsel %vm96_vm13, %v97_v18, %v95_v16 }
 0x112   :  { %v119_v19 = vmul.f32 %v256_v51, %v118_v11 }
 0x113   :  { %v200_v20 = vmul.f32 %v258_v53, %v199_v15  ;;  %v99_v26 = vadd.f32 %v98_v23, %v72_v17 }
 0x114   :  { %v120_v33 = vmul.f32 %v119_v19, %v342_v40 }
 0x115   :  { %v201_v28 = vmul.f32 %v200_v20, %v344_v41 }
 0x116   :  { %v122_v27 = vsel %vm121_vm14, %v342_v40, %v120_v33 }
 0x117   :  { %v125_v14 = vsel %vm123_vm15, %v124_v24, %v122_v27  ;;  %v203_v36 = vsel %vm202_vm2, %v344_v41, %v201_v28 }
 0x118   :  { %v126_v31 = vadd.f32 %v125_v14, %v99_v26  ;;  %v206_v39 = vsel %vm204_vm4, %v205_v0, %v203_v36 }
 0x11a   :  { %v153_v35 = vadd.f32 %v152_v32, %v126_v31  ;;  %v222_v25 = vpop.xlane.xlu1 %221 }
 0x11b   :  { %v223_v4 = vrot.slane %v222_v25, 4 }
 0x11c   :  { %v180_v38 = vadd.f32 %v179_v37, %v153_v35 }
 0x11d   :  { %v224_v45 = vadd.f32 %v223_v4, %v222_v25 }
 0x11e   :  { %v207_v40 = vadd.f32 %v206_v39, %v180_v38 }
 0x11f   :  { %v225_v46 = vrot.slane %v224_v45, 2 }
 0x120   :  { %v209_v42 = vadd.f32 %v208_v59, %v207_v40 }
 0x121   :  { %v226_v47 = vadd.f32 %v225_v46, %v224_v45 }
 0x122   :  { %210 = vst [vmem:[#allocation2] sm:$0x1] %v209_v42 }
 0x123   :  { %v227_v48 = vrot.slane %v226_v47, 1 }
 0x125   :  { %v228_v49 = vadd.f32 %v227_v48, %v226_v47 }
 0x127   :  { %v230_v52 = vmul.f32 0.001, %v228_v49 }
 0x129   :  { %v214_v43 = vld [vmem:[#allocation2] sm:$0x1] }
 0x12a   :  { %v216_v44 = vsel %vm215_vm5, %v214_v43, 0.0 }
 0x12b   :  { %217 = vadd.xlane.f32.xlu2 %v216_v44 }
 0x19e   :  { %v218_v50 = vpop.xlane.xlu2 %217 }
 0x19f   :  { %v229_v51 = vmul.f32 0.035714287, %v218_v50 }
 0x1a1   :  { %v231_v41 = vadd.f32 %v230_v52, %v229_v51 }
 0x1a3   :  { %v232_v53 = vperm.slane %v231_v41, 0 }
 0x1a5   :  { %233 = vst [vmem:[%s385_s2] sm:$0xff] %v232_v53 }

</bundles_post_ra>
